<compile_context>
chip_gen: v6e
topology: v6e:2x2x1
jax: 0.10.0
libtpu: 0.0.40
codegen_flags: <defaults>
</compile_context>

<pallas_src>
import functools

import jax
import jax.numpy as jnp
from jax import lax
from jax.experimental import pallas as pl
from jax.experimental.pallas import tpu as pltpu

_EPS = 1e-5


def _vmem_capacity_bytes():
    """Generation-aware VMEM capacity; conservative 64 MiB (v7x) fallback."""
    try:
        info = pltpu.get_tpu_info()
        cap = getattr(info, "vmem_capacity_bytes", None)
        if cap:
            return int(cap)
    except Exception:
        pass
    return 64 << 20


def _choose_tile(hw, f_g, f_l, f_int, tile_budget_bytes):
    """Pixel-tile width T for the lane axis, sized by the pass-2 working set.

    Working set per pixel column (f32): double-buffered g/x input tiles
    (2*2*(F_g+F_l)), ~3 live (F_int, T) temporaries, double-buffered (1, T)
    psi output.  Prefer a 128-multiple divisor of hw (unmasked stores, no
    tail); otherwise a fixed 128-multiple tile with a masked tail block.
    """
    bytes_per_col = 4 * (2 * 2 * (f_g + f_l) + 3 * f_int + 2 * 2)
    t_cap = max(128, (tile_budget_bytes // bytes_per_col) // 128 * 128)
    if hw <= t_cap:
        return hw                        # whole image row: block == full dim
    for t in range(t_cap, 0, -128):      # largest 128-multiple divisor of hw
        if hw % t == 0:
            return t
    return t_cap                         # no divisor: masked tail block


def _lane_mask(t_global, tile, hw):
    """Mask of valid lanes for (possibly partial) pixel tile `t_global`."""
    valid = hw - t_global * tile
    lane = lax.broadcasted_iota(jnp.int32, (1, tile), 1)
    return lane < valid


# --------------------------------------------------------------------------------------
# Pass 1: per-channel sums and Gram matrices of the raw inputs (for analytic BN stats).
# --------------------------------------------------------------------------------------
def _stats_kernel(g_ref, x_ref, gram_g_ref, sum_g_ref, gram_x_ref, sum_x_ref,
                  *, n_outer, n_inner, tile, hw, has_tail):
    @pl.when(pl.program_id(1) == 0)
    def _init():
        gram_g_ref[...] = jnp.zeros_like(gram_g_ref)
        sum_g_ref[...] = jnp.zeros_like(sum_g_ref)
        gram_x_ref[...] = jnp.zeros_like(gram_x_ref)
        sum_x_ref[...] = jnp.zeros_like(sum_x_ref)

    g = g_ref[0]  # (F_g, T) -- channels on sublanes, pixels on lanes
    x = x_ref[0]  # (F_l, T)

    if has_tail:  # zero-out the out-of-range lanes of the last pixel tile
        t_global = (pl.program_id(0) % n_outer) * n_inner + pl.program_id(1)
        mask = _lane_mask(t_global, tile, hw)
        g = jnp.where(mask, g, 0.0)
        x = jnp.where(mask, x, 0.0)

    contract_last = (((1,), (1,)), ((), ()))  # a @ a.T without materializing a.T
    gram_g_ref[0] = gram_g_ref[0] + lax.dot_general(
        g, g, contract_last, preferred_element_type=jnp.float32)
    sum_g_ref[0] = sum_g_ref[0] + jnp.sum(g, axis=1, keepdims=True)
    gram_x_ref[0] = gram_x_ref[0] + lax.dot_general(
        x, x, contract_last, preferred_element_type=jnp.float32)
    sum_x_ref[0] = sum_x_ref[0] + jnp.sum(x, axis=1, keepdims=True)


# --------------------------------------------------------------------------------------
# Pass 2: folded (BN-baked) convs + ReLU + psi projection; accumulates psi pre-BN stats.
# Folded parameters arrive as four separate grid-invariant inputs (no in-kernel
# lane slicing at unaligned offsets).
# --------------------------------------------------------------------------------------
def _fused_gating_kernel(g_ref, x_ref, wg_ref, wx_ref, bf_ref, wp_ref,
                         p_ref, psum_ref, psq_ref,
                         *, n_outer, n_inner, tile, hw, has_tail):
    pre = (jnp.dot(wg_ref[...], g_ref[0], preferred_element_type=jnp.float32)
           + jnp.dot(wx_ref[...], x_ref[0], preferred_element_type=jnp.float32)
           + bf_ref[...])                                # == BN(g1)+BN(x1), (F_int, T)
    r = jnp.maximum(pre, 0.0)

    f_int = r.shape[0]
    if f_int >= 128:
        # Wide contraction: use the (mostly idle) MXU and keep the VALU slot free.
        p = lax.dot_general(wp_ref[...], r, (((0,), (0,)), ((), ())),
                            preferred_element_type=jnp.float32)        # (1, T)
    else:
        # Small F_int: VPU multiply + sublane reduce avoids a 1-wide MXU output.
        p = jnp.sum(r * wp_ref[...], axis=0, keepdims=True)            # (1, T)
    p_ref[0] = p

    @pl.when(pl.program_id(1) == 0)
    def _init():
        psum_ref[...] = jnp.zeros_like(psum_ref)
        psq_ref[...] = jnp.zeros_like(psq_ref)

    if has_tail:  # don't let the garbage tail lanes pollute the psi statistics
        t_global = (pl.program_id(0) % n_outer) * n_inner + pl.program_id(1)
        mask = _lane_mask(t_global, tile, hw)
        p_stat = jnp.where(mask, p, 0.0)
    else:
        p_stat = p

    psum_ref[0] = psum_ref[0] + jnp.sum(p_stat, axis=1, keepdims=True)
    psq_ref[0] = psq_ref[0] + jnp.sum(p_stat * p_stat, axis=1, keepdims=True)


# --------------------------------------------------------------------------------------
# Pass 3: scalar psi BatchNorm + sigmoid + gate, fully parallel, lane-dense store.
# The two BN scalars live in SMEM (no VMEM vreg tile, no per-tile lane slices).
# --------------------------------------------------------------------------------------
def _gate_kernel(x_ref, p_ref, aff_ref, out_ref):
    a = aff_ref[0]                                       # scalar from SMEM
    b = aff_ref[1]
    gate = jax.nn.sigmoid(p_ref[0] * a + b)              # (1, T)
    out_ref[0] = x_ref[0] * gate                         # (F_l, T), sublane broadcast


@jax.jit
def attention_block(g, x, params):
    """g: (N, F_g, H, W), x: (N, F_l, H, W) NCHW float32. Returns x * psi (NCHW)."""
    (wg, bg, gam_g, bet_g,
     wx, bx, gam_x, bet_x,
     wp, bp, gam_p, bet_p) = params
    del bp  # psi conv bias is removed by the train-mode BN mean subtraction

    N, F_g, H, W = g.shape
    _, F_l, _, _ = x.shape
    F_int = wg.shape[1]
    HW = H * W
    P = N * HW
    fp32 = jnp.float32

    # ---- generation-aware tiling / VMEM budgeting ----
    vmem_cap = _vmem_capacity_bytes()                 # 64 MiB (v7x) .. 128 MiB (v5e/v6e)
    vmem_limit = int(vmem_cap * 3 // 4)               # explicit scoped-VMEM limit
    tile_budget = vmem_limit // 2                     # headroom for compiler scratch
    T = _choose_tile(HW, F_g, F_l, F_int, tile_budget)
    n_t = -(-HW // T)
    has_tail = (HW % T) != 0

    # v7x megacore: guarantee >=2 blocks on the parallel axis of passes 1-2 even
    # when N == 1 by splitting the pixel tiles into an outer "parallel" half.
    n_outer = 2 if (N == 1 and n_t >= 2 and n_t % 2 == 0) else 1
    n_inner = n_t // n_outer
    n_par = N * n_outer

    if n_outer == 1:
        def _in_map(p, i):
            return (p, 0, i)
    else:
        def _in_map(p, i):
            return (p // n_outer, 0, (p % n_outer) * n_inner + i)

    def _acc_map(p, i):
        return (p, 0, 0)

    g3 = g.reshape(N, F_g, HW).astype(fp32)   # pure reshape: stays channels-major
    x3 = x.reshape(N, F_l, HW).astype(fp32)

    # ---- pass 1: input sums + Gram matrices (per-(batch,outer) partials) ----
    gram_g_p, sum_g_p, gram_x_p, sum_x_p = pl.pallas_call(
        functools.partial(_stats_kernel, n_outer=n_outer, n_inner=n_inner,
                          tile=T, hw=HW, has_tail=has_tail),
        grid=(n_par, n_inner),
        in_specs=[pl.BlockSpec((1, F_g, T), _in_map),
                  pl.BlockSpec((1, F_l, T), _in_map)],
        out_specs=[pl.BlockSpec((1, F_g, F_g), _acc_map),
                   pl.BlockSpec((1, F_g, 1), _acc_map),
                   pl.BlockSpec((1, F_l, F_l), _acc_map),
                   pl.BlockSpec((1, F_l, 1), _acc_map)],
        out_shape=(jax.ShapeDtypeStruct((n_par, F_g, F_g), fp32),
                   jax.ShapeDtypeStruct((n_par, F_g, 1), fp32),
                   jax.ShapeDtypeStruct((n_par, F_l, F_l), fp32),
                   jax.ShapeDtypeStruct((n_par, F_l, 1), fp32)),
        compiler_params=pltpu.CompilerParams(
            dimension_semantics=("parallel", "arbitrary"),
            vmem_limit_bytes=vmem_limit),
        cost_estimate=pl.CostEstimate(
            flops=2 * P * (F_g * F_g + F_l * F_l),
            transcendentals=0,
            bytes_accessed=4 * P * (F_g + F_l)),
    )(g3, x3)

    # ---- tiny host-side math: analytic BN stats of the conv outputs + weight folding ----
    mu_g = sum_g_p.sum(axis=0) / P                       # (F_g, 1)
    cov_g = gram_g_p.sum(axis=0) / P - mu_g @ mu_g.T     # biased covariance
    mu_x = sum_x_p.sum(axis=0) / P
    cov_x = gram_x_p.sum(axis=0) / P - mu_x @ mu_x.T

    mean_g1 = (wg.T @ mu_g).reshape(-1) + bg.reshape(-1)   # (F_int,)
    var_g1 = jnp.sum(wg * (cov_g @ wg), axis=0)            # diag(Wg^T Cov Wg)
    a_g = gam_g.reshape(-1) * lax.rsqrt(var_g1 + _EPS)

    mean_x1 = (wx.T @ mu_x).reshape(-1) + bx.reshape(-1)
    var_x1 = jnp.sum(wx * (cov_x @ wx), axis=0)
    a_x = gam_x.reshape(-1) * lax.rsqrt(var_x1 + _EPS)

    wf_g = (a_g[:, None] * wg.T).astype(fp32)               # (F_int, F_g), BN baked in
    wf_x = (a_x[:, None] * wx.T).astype(fp32)                # (F_int, F_l)
    bf = (a_g * (bg.reshape(-1) - mean_g1) + bet_g.reshape(-1)
          + a_x * (bx.reshape(-1) - mean_x1) + bet_x.reshape(-1))
    bf_col = bf[:, None].astype(fp32)                        # (F_int, 1)
    wp_col = wp.reshape(F_int, 1).astype(fp32)               # (F_int, 1)

    # ---- pass 2: fused gating sweep + psi pre-BN stats ----
    p_pre, psum_p, psq_p = pl.pallas_call(
        functools.partial(_fused_gating_kernel, n_outer=n_outer, n_inner=n_inner,
                          tile=T, hw=HW, has_tail=has_tail),
        grid=(n_par, n_inner),
        in_specs=[pl.BlockSpec((1, F_g, T), _in_map),
                  pl.BlockSpec((1, F_l, T), _in_map),
                  pl.BlockSpec((F_int, F_g), lambda p, i: (0, 0)),
                  pl.BlockSpec((F_int, F_l), lambda p, i: (0, 0)),
                  pl.BlockSpec((F_int, 1), lambda p, i: (0, 0)),
                  pl.BlockSpec((F_int, 1), lambda p, i: (0, 0))],
        out_specs=[pl.BlockSpec((1, 1, T), _in_map),
                   pl.BlockSpec((1, 1, 1), _acc_map),
                   pl.BlockSpec((1, 1, 1), _acc_map)],
        out_shape=(jax.ShapeDtypeStruct((N, 1, HW), fp32),
                   jax.ShapeDtypeStruct((n_par, 1, 1), fp32),
                   jax.ShapeDtypeStruct((n_par, 1, 1), fp32)),
        compiler_params=pltpu.CompilerParams(
            dimension_semantics=("parallel", "arbitrary"),
            vmem_limit_bytes=vmem_limit),
        cost_estimate=pl.CostEstimate(
            flops=2 * P * F_int * (F_g + F_l + 1),
            transcendentals=0,
            bytes_accessed=4 * P * (F_g + F_l + 1)),
    )(g3, x3, wf_g, wf_x, bf_col, wp_col)

    # ---- psi BatchNorm scalars (global over all pixels) ----
    mean_p = psum_p.sum() / P
    var_p = psq_p.sum() / P - mean_p * mean_p              # biased
    a_p = gam_p.reshape(()) * lax.rsqrt(var_p + _EPS)
    b_p = bet_p.reshape(()) - mean_p * a_p
    psi_aff = jnp.stack([a_p, b_p]).astype(fp32)           # (2,) -> SMEM scalars

    # ---- pass 3: sigmoid gate applied to x (lane-dense, fully parallel) ----
    out3 = pl.pallas_call(
        _gate_kernel,
        grid=(N, n_t),
        in_specs=[pl.BlockSpec((1, F_l, T), lambda n, t: (n, 0, t)),
                  pl.BlockSpec((1, 1, T), lambda n, t: (n, 0, t)),
                  pl.BlockSpec(memory_space=pltpu.MemorySpace.SMEM)],
        out_specs=pl.BlockSpec((1, F_l, T), lambda n, t: (n, 0, t)),
        out_shape=jax.ShapeDtypeStruct((N, F_l, HW), fp32),
        compiler_params=pltpu.CompilerParams(
            dimension_semantics=("parallel", "parallel"),
            vmem_limit_bytes=vmem_limit),
        cost_estimate=pl.CostEstimate(
            flops=4 * P * F_l,
            transcendentals=P,
            bytes_accessed=4 * P * (2 * F_l + 1)),
    )(x3, p_pre, psi_aff)

    return out3.reshape(N, F_l, H, W)


def make_params(key, F_g, F_l, F_int):
    """Deterministic synthetic parameters (conv weights stored as (Cin, Cout))."""
    ks = jax.random.split(key, 9)
    wg = 0.1 * jax.random.normal(ks[0], (F_g, F_int), jnp.float32)
    bg = 0.1 * jax.random.normal(ks[1], (1, F_int), jnp.float32)
    gam_g = 1.0 + 0.1 * jax.random.normal(ks[2], (1, F_int), jnp.float32)
    bet_g = 0.1 * jax.random.normal(ks[3], (1, F_int), jnp.float32)

    wx = 0.1 * jax.random.normal(ks[4], (F_l, F_int), jnp.float32)
    bx = 0.1 * jax.random.normal(ks[5], (1, F_int), jnp.float32)
    gam_x = 1.0 + 0.1 * jax.random.normal(ks[6], (1, F_int), jnp.float32)
    bet_x = 0.1 * jax.random.normal(ks[7], (1, F_int), jnp.float32)

    kp = jax.random.split(ks[8], 4)
    wp = 0.1 * jax.random.normal(kp[0], (F_int, 1), jnp.float32)
    bp = 0.1 * jax.random.normal(kp[1], (1, 1), jnp.float32)
    gam_p = 1.0 + 0.1 * jax.random.normal(kp[2], (1, 1), jnp.float32)
    bet_p = 0.1 * jax.random.normal(kp[3], (1, 1), jnp.float32)

    return (wg, bg, gam_g, bet_g,
            wx, bx, gam_x, bet_x,
            wp, bp, gam_p, bet_p)


def attention_block_ref(g, x, params):
    """Pure-JAX NCHW reference mirroring the PyTorch module exactly (train-mode BN)."""
    (wg, bg, gam_g, bet_g, wx, bx, gam_x, bet_x, wp, bp, gam_p, bet_p) = params

    def conv1x1(a, w, b):  # a: NCHW, w: (Cin, Cout), b: (1, Cout)
        return jnp.einsum('nchw,cd->ndhw', a, w) + b.reshape(1, -1, 1, 1)

    def bn_train(y, gamma, beta):
        mean = y.mean(axis=(0, 2, 3), keepdims=True)
        var = ((y - mean) ** 2).mean(axis=(0, 2, 3), keepdims=True)  # biased
        return ((y - mean) * lax.rsqrt(var + _EPS) * gamma.reshape(1, -1, 1, 1)
                + beta.reshape(1, -1, 1, 1))

    g1 = bn_train(conv1x1(g, wg, bg), gam_g, bet_g)
    x1 = bn_train(conv1x1(x, wx, bx), gam_x, bet_x)
    r = jnp.maximum(g1 + x1, 0.0)
    p = jax.nn.sigmoid(bn_train(conv1x1(r, wp, bp), gam_p, bet_p))
    return x * p


if __name__ == "__main__":
    # Small shapes: batch=2, F_g=F_l=4, F_int=32, spatial 16x16
    F_g, F_l, F_int = 4, 4, 32
    key = jax.random.PRNGKey(0)
    kg, kx, kp = jax.random.split(key, 3)

    g = jax.random.normal(kg, (2, F_g, 16, 16), jnp.float32)
    x = jax.random.normal(kx, (2, F_l, 16, 16), jnp.float32)
    params = make_params(kp, F_g, F_l, F_int)

    out = attention_block(g, x, params)
    out = jax.block_until_ready(out)

    ref = attention_block_ref(g, x, params)
    assert out.shape == x.shape
    max_err = jnp.max(jnp.abs(out - ref))
    assert jnp.allclose(out, ref, atol=1e-4, rtol=1e-4), f"mismatch vs ref: {max_err}"

    print("KERNEL_OK")
</pallas_src>

<mosaic_0001>
module attributes {stable_mosaic.version = 11 : i64} {
  func.func @_stats_kernel(%arg0: i32, %arg1: i32, %arg2: memref<1x4x256xf32, #tpu.memory_space<vmem>>, %arg3: memref<1x4x256xf32, #tpu.memory_space<vmem>>, %arg4: memref<1x4x4xf32, #tpu.memory_space<vmem>>, %arg5: memref<1x4x1xf32, #tpu.memory_space<vmem>>, %arg6: memref<1x4x4xf32, #tpu.memory_space<vmem>>, %arg7: memref<1x4x1xf32, #tpu.memory_space<vmem>>) attributes {dimension_semantics = [#tpu.dimension_semantics<parallel>, #tpu.dimension_semantics<arbitrary>], iteration_bounds = array<i64: 2, 1>, scalar_prefetch = 0 : i64, scratch_operands = 0 : i64, tpu.core_type = #tpu.core_type<tc>, window_params = [{transform_indices = @transform_0, window_bounds = array<i64: 1, 4, 256>}, {transform_indices = @transform_1, window_bounds = array<i64: 1, 4, 256>}, {transform_indices = @transform_2, window_bounds = array<i64: 1, 4, 4>}, {transform_indices = @transform_3, window_bounds = array<i64: 1, 4, 1>}, {transform_indices = @transform_4, window_bounds = array<i64: 1, 4, 4>}, {transform_indices = @transform_5, window_bounds = array<i64: 1, 4, 1>}]} {
    %c0_i32 = arith.constant 0 : i32
    %0 = arith.cmpi eq, %arg1, %c0_i32 : i32
    %1 = arith.extui %0 : i1 to i32
    %c0_i32_0 = arith.constant 0 : i32
    %2 = arith.cmpi ne, %1, %c0_i32_0 : i32
    scf.if %2 {
      %cst_33 = arith.constant 0.000000e+00 : f32
      %37 = vector.broadcast %cst_33 : f32 to vector<1x4x4xf32>
      %c0_34 = arith.constant 0 : index
      %c0_35 = arith.constant 0 : index
      %c0_36 = arith.constant 0 : index
      %38 = vector.load %arg4[%c0_34, %c0_35, %c0_36] : memref<1x4x4xf32, #tpu.memory_space<vmem>>, vector<1x4x4xf32>
      tpu.vector_store %arg4[%c0_34, %c0_35, %c0_36], %37 {strides = array<i32>} : memref<1x4x4xf32, #tpu.memory_space<vmem>>, vector<1x4x4xf32>,
      %cst_37 = arith.constant 0.000000e+00 : f32
      %39 = vector.broadcast %cst_37 : f32 to vector<1x4x1xf32>
      %c0_38 = arith.constant 0 : index
      %c0_39 = arith.constant 0 : index
      %c0_40 = arith.constant 0 : index
      %40 = vector.load %arg5[%c0_38, %c0_39, %c0_40] : memref<1x4x1xf32, #tpu.memory_space<vmem>>, vector<1x4x1xf32>
      tpu.vector_store %arg5[%c0_38, %c0_39, %c0_40], %39 {strides = array<i32>} : memref<1x4x1xf32, #tpu.memory_space<vmem>>, vector<1x4x1xf32>,
      %cst_41 = arith.constant 0.000000e+00 : f32
      %41 = vector.broadcast %cst_41 : f32 to vector<1x4x4xf32>
      %c0_42 = arith.constant 0 : index
      %c0_43 = arith.constant 0 : index
      %c0_44 = arith.constant 0 : index
      %42 = vector.load %arg6[%c0_42, %c0_43, %c0_44] : memref<1x4x4xf32, #tpu.memory_space<vmem>>, vector<1x4x4xf32>
      tpu.vector_store %arg6[%c0_42, %c0_43, %c0_44], %41 {strides = array<i32>} : memref<1x4x4xf32, #tpu.memory_space<vmem>>, vector<1x4x4xf32>,
      %cst_45 = arith.constant 0.000000e+00 : f32
      %43 = vector.broadcast %cst_45 : f32 to vector<1x4x1xf32>
      %c0_46 = arith.constant 0 : index
      %c0_47 = arith.constant 0 : index
      %c0_48 = arith.constant 0 : index
      %44 = vector.load %arg7[%c0_46, %c0_47, %c0_48] : memref<1x4x1xf32, #tpu.memory_space<vmem>>, vector<1x4x1xf32>
      tpu.vector_store %arg7[%c0_46, %c0_47, %c0_48], %43 {strides = array<i32>} : memref<1x4x1xf32, #tpu.memory_space<vmem>>, vector<1x4x1xf32>,
    } else {
    }
    %c0 = arith.constant 0 : index
    %c0_1 = arith.constant 0 : index
    %c0_2 = arith.constant 0 : index
    %3 = vector.load %arg2[%c0, %c0_1, %c0_2] : memref<1x4x256xf32, #tpu.memory_space<vmem>>, vector<1x4x256xf32>
    %4 = vector.shape_cast %3 : vector<1x4x256xf32> to vector<4x256xf32>
    %c0_3 = arith.constant 0 : index
    %c0_4 = arith.constant 0 : index
    %c0_5 = arith.constant 0 : index
    %5 = vector.load %arg3[%c0_3, %c0_4, %c0_5] : memref<1x4x256xf32, #tpu.memory_space<vmem>>, vector<1x4x256xf32>
    %6 = vector.shape_cast %5 : vector<1x4x256xf32> to vector<4x256xf32>
    %c0_6 = arith.constant 0 : index
    %c0_7 = arith.constant 0 : index
    %c0_8 = arith.constant 0 : index
    %7 = vector.load %arg4[%c0_6, %c0_7, %c0_8] : memref<1x4x4xf32, #tpu.memory_space<vmem>>, vector<1x4x4xf32>
    %8 = vector.shape_cast %7 : vector<1x4x4xf32> to vector<4x4xf32>
    %cst = arith.constant dense<0.000000e+00> : vector<4x4xf32>
    %9 = tpu.matmul %4, %4, %cst {dimension_numbers = #tpu.dot_dimension_numbers<[1], [1], [0], [0], [0, 0, 1, 0], [], []>} : vector<4x256xf32>, vector<4x256xf32>, vector<4x4xf32> -> vector<4x4xf32>
    %10 = arith.addf %8, %9 : vector<4x4xf32>
    %c0_9 = arith.constant 0 : index
    %c0_10 = arith.constant 0 : index
    %c0_11 = arith.constant 0 : index
    %11 = vector.load %arg4[%c0_9, %c0_10, %c0_11] : memref<1x4x4xf32, #tpu.memory_space<vmem>>, vector<1x4x4xf32>
    %12 = vector.shape_cast %11 : vector<1x4x4xf32> to vector<4x4xf32>
    %13 = vector.shape_cast %10 : vector<4x4xf32> to vector<1x4x4xf32>
    tpu.vector_store %arg4[%c0_9, %c0_10, %c0_11], %13 {strides = array<i32>} : memref<1x4x4xf32, #tpu.memory_space<vmem>>, vector<1x4x4xf32>,
    %c0_12 = arith.constant 0 : index
    %c0_13 = arith.constant 0 : index
    %c0_14 = arith.constant 0 : index
    %14 = vector.load %arg5[%c0_12, %c0_13, %c0_14] : memref<1x4x1xf32, #tpu.memory_space<vmem>>, vector<1x4x1xf32>
    %15 = vector.shape_cast %14 : vector<1x4x1xf32> to vector<4x1xf32>
    %cst_15 = arith.constant dense<0.000000e+00> : vector<4xf32>
    %16 = vector.multi_reduction <add>, %4, %cst_15 [1] : vector<4x256xf32> to vector<4xf32>
    %17 = vector.shape_cast %16 : vector<4xf32> to vector<4x1xf32>
    %18 = arith.addf %15, %17 : vector<4x1xf32>
    %c0_16 = arith.constant 0 : index
    %c0_17 = arith.constant 0 : index
    %c0_18 = arith.constant 0 : index
    %19 = vector.load %arg5[%c0_16, %c0_17, %c0_18] : memref<1x4x1xf32, #tpu.memory_space<vmem>>, vector<1x4x1xf32>
    %20 = vector.shape_cast %19 : vector<1x4x1xf32> to vector<4x1xf32>
    %21 = vector.shape_cast %18 : vector<4x1xf32> to vector<1x4x1xf32>
    tpu.vector_store %arg5[%c0_16, %c0_17, %c0_18], %21 {strides = array<i32>} : memref<1x4x1xf32, #tpu.memory_space<vmem>>, vector<1x4x1xf32>,
    %c0_19 = arith.constant 0 : index
    %c0_20 = arith.constant 0 : index
    %c0_21 = arith.constant 0 : index
    %22 = vector.load %arg6[%c0_19, %c0_20, %c0_21] : memref<1x4x4xf32, #tpu.memory_space<vmem>>, vector<1x4x4xf32>
    %23 = vector.shape_cast %22 : vector<1x4x4xf32> to vector<4x4xf32>
    %cst_22 = arith.constant dense<0.000000e+00> : vector<4x4xf32>
    %24 = tpu.matmul %6, %6, %cst_22 {dimension_numbers = #tpu.dot_dimension_numbers<[1], [1], [0], [0], [0, 0, 1, 0], [], []>} : vector<4x256xf32>, vector<4x256xf32>, vector<4x4xf32> -> vector<4x4xf32>
    %25 = arith.addf %23, %24 : vector<4x4xf32>
    %c0_23 = arith.constant 0 : index
    %c0_24 = arith.constant 0 : index
    %c0_25 = arith.constant 0 : index
    %26 = vector.load %arg6[%c0_23, %c0_24, %c0_25] : memref<1x4x4xf32, #tpu.memory_space<vmem>>, vector<1x4x4xf32>
    %27 = vector.shape_cast %26 : vector<1x4x4xf32> to vector<4x4xf32>
    %28 = vector.shape_cast %25 : vector<4x4xf32> to vector<1x4x4xf32>
    tpu.vector_store %arg6[%c0_23, %c0_24, %c0_25], %28 {strides = array<i32>} : memref<1x4x4xf32, #tpu.memory_space<vmem>>, vector<1x4x4xf32>,
    %c0_26 = arith.constant 0 : index
    %c0_27 = arith.constant 0 : index
    %c0_28 = arith.constant 0 : index
    %29 = vector.load %arg7[%c0_26, %c0_27, %c0_28] : memref<1x4x1xf32, #tpu.memory_space<vmem>>, vector<1x4x1xf32>
    %30 = vector.shape_cast %29 : vector<1x4x1xf32> to vector<4x1xf32>
    %cst_29 = arith.constant dense<0.000000e+00> : vector<4xf32>
    %31 = vector.multi_reduction <add>, %6, %cst_29 [1] : vector<4x256xf32> to vector<4xf32>
    %32 = vector.shape_cast %31 : vector<4xf32> to vector<4x1xf32>
    %33 = arith.addf %30, %32 : vector<4x1xf32>
    %c0_30 = arith.constant 0 : index
    %c0_31 = arith.constant 0 : index
    %c0_32 = arith.constant 0 : index
    %34 = vector.load %arg7[%c0_30, %c0_31, %c0_32] : memref<1x4x1xf32, #tpu.memory_space<vmem>>, vector<1x4x1xf32>
    %35 = vector.shape_cast %34 : vector<1x4x1xf32> to vector<4x1xf32>
    %36 = vector.shape_cast %33 : vector<4x1xf32> to vector<1x4x1xf32>
    tpu.vector_store %arg7[%c0_30, %c0_31, %c0_32], %36 {strides = array<i32>} : memref<1x4x1xf32, #tpu.memory_space<vmem>>, vector<1x4x1xf32>,
    return
  }
  func.func @transform_0(%arg0: i32, %arg1: i32) -> (i32, i32, i32) {
    %c0_i32 = arith.constant 0 : i32
    %c0_i32_0 = arith.constant 0 : i32
    return %arg0, %c0_i32, %arg1 : i32, i32, i32
  }
  func.func @transform_1(%arg0: i32, %arg1: i32) -> (i32, i32, i32) {
    %c0_i32 = arith.constant 0 : i32
    %c0_i32_0 = arith.constant 0 : i32
    return %arg0, %c0_i32, %arg1 : i32, i32, i32
  }
  func.func @transform_2(%arg0: i32, %arg1: i32) -> (i32, i32, i32) {
    %c0_i32 = arith.constant 0 : i32
    %c0_i32_0 = arith.constant 0 : i32
    %c0_i32_1 = arith.constant 0 : i32
    return %arg0, %c0_i32, %c0_i32_0 : i32, i32, i32
  }
  func.func @transform_3(%arg0: i32, %arg1: i32) -> (i32, i32, i32) {
    %c0_i32 = arith.constant 0 : i32
    %c0_i32_0 = arith.constant 0 : i32
    %c0_i32_1 = arith.constant 0 : i32
    return %arg0, %c0_i32, %c0_i32_0 : i32, i32, i32
  }
  func.func @transform_4(%arg0: i32, %arg1: i32) -> (i32, i32, i32) {
    %c0_i32 = arith.constant 0 : i32
    %c0_i32_0 = arith.constant 0 : i32
    %c0_i32_1 = arith.constant 0 : i32
    return %arg0, %c0_i32, %c0_i32_0 : i32, i32, i32
  }
  func.func @transform_5(%arg0: i32, %arg1: i32) -> (i32, i32, i32) {
    %c0_i32 = arith.constant 0 : i32
    %c0_i32_0 = arith.constant 0 : i32
    %c0_i32_1 = arith.constant 0 : i32
    return %arg0, %c0_i32, %c0_i32_0 : i32, i32, i32
  }
}

module attributes {stable_mosaic.version = 11 : i64} {
  func.func @_fused_gating_kernel(%arg0: i32, %arg1: i32, %arg2: memref<1x4x256xf32, #tpu.memory_space<vmem>>, %arg3: memref<1x4x256xf32, #tpu.memory_space<vmem>>, %arg4: memref<32x4xf32, #tpu.memory_space<vmem>>, %arg5: memref<32x4xf32, #tpu.memory_space<vmem>>, %arg6: memref<32x1xf32, #tpu.memory_space<vmem>>, %arg7: memref<32x1xf32, #tpu.memory_space<vmem>>, %arg8: memref<1x1x256xf32, #tpu.memory_space<vmem>>, %arg9: memref<1x1x1xf32, #tpu.memory_space<vmem>>, %arg10: memref<1x1x1xf32, #tpu.memory_space<vmem>>) attributes {dimension_semantics = [#tpu.dimension_semantics<parallel>, #tpu.dimension_semantics<arbitrary>], iteration_bounds = array<i64: 2, 1>, scalar_prefetch = 0 : i64, scratch_operands = 0 : i64, tpu.core_type = #tpu.core_type<tc>, window_params = [{transform_indices = @transform_0, window_bounds = array<i64: 1, 4, 256>}, {transform_indices = @transform_1, window_bounds = array<i64: 1, 4, 256>}, {pipeline_mode = #tpu.pipeline_mode<synchronous>, transform_indices = @transform_2, window_bounds = array<i64: 32, 4>}, {pipeline_mode = #tpu.pipeline_mode<synchronous>, transform_indices = @transform_3, window_bounds = array<i64: 32, 4>}, {pipeline_mode = #tpu.pipeline_mode<synchronous>, transform_indices = @transform_4, window_bounds = array<i64: 32, 1>}, {pipeline_mode = #tpu.pipeline_mode<synchronous>, transform_indices = @transform_5, window_bounds = array<i64: 32, 1>}, {transform_indices = @transform_6, window_bounds = array<i64: 1, 1, 256>}, {transform_indices = @transform_7, window_bounds = array<i64: 1, 1, 1>}, {transform_indices = @transform_8, window_bounds = array<i64: 1, 1, 1>}]} {
    %c0 = arith.constant 0 : index
    %c0_0 = arith.constant 0 : index
    %0 = vector.load %arg4[%c0, %c0_0] : memref<32x4xf32, #tpu.memory_space<vmem>>, vector<32x4xf32>
    %c0_1 = arith.constant 0 : index
    %c0_2 = arith.constant 0 : index
    %c0_3 = arith.constant 0 : index
    %1 = vector.load %arg2[%c0_1, %c0_2, %c0_3] : memref<1x4x256xf32, #tpu.memory_space<vmem>>, vector<1x4x256xf32>
    %2 = vector.shape_cast %1 : vector<1x4x256xf32> to vector<4x256xf32>
    %cst = arith.constant dense<0.000000e+00> : vector<32x256xf32>
    %3 = tpu.matmul %0, %2, %cst {dimension_numbers = #tpu.dot_dimension_numbers<[1], [0], [0], [1], [0, 0, 1, 1], [], []>} : vector<32x4xf32>, vector<4x256xf32>, vector<32x256xf32> -> vector<32x256xf32>
    %c0_4 = arith.constant 0 : index
    %c0_5 = arith.constant 0 : index
    %4 = vector.load %arg5[%c0_4, %c0_5] : memref<32x4xf32, #tpu.memory_space<vmem>>, vector<32x4xf32>
    %c0_6 = arith.constant 0 : index
    %c0_7 = arith.constant 0 : index
    %c0_8 = arith.constant 0 : index
    %5 = vector.load %arg3[%c0_6, %c0_7, %c0_8] : memref<1x4x256xf32, #tpu.memory_space<vmem>>, vector<1x4x256xf32>
    %6 = vector.shape_cast %5 : vector<1x4x256xf32> to vector<4x256xf32>
    %cst_9 = arith.constant dense<0.000000e+00> : vector<32x256xf32>
    %7 = tpu.matmul %4, %6, %cst_9 {dimension_numbers = #tpu.dot_dimension_numbers<[1], [0], [0], [1], [0, 0, 1, 1], [], []>} : vector<32x4xf32>, vector<4x256xf32>, vector<32x256xf32> -> vector<32x256xf32>
    %8 = arith.addf %3, %7 : vector<32x256xf32>
    %c0_10 = arith.constant 0 : index
    %c0_11 = arith.constant 0 : index
    %9 = vector.load %arg6[%c0_10, %c0_11] : memref<32x1xf32, #tpu.memory_space<vmem>>, vector<32x1xf32>
    %10 = vector.broadcast %9 : vector<32x1xf32> to vector<32x256xf32>
    %11 = arith.addf %8, %10 : vector<32x256xf32>
    %cst_12 = arith.constant 0.000000e+00 : f32
    %12 = vector.broadcast %cst_12 : f32 to vector<32x256xf32>
    %13 = arith.maximumf %11, %12 : vector<32x256xf32>
    %c0_13 = arith.constant 0 : index
    %c0_14 = arith.constant 0 : index
    %14 = vector.load %arg7[%c0_13, %c0_14] : memref<32x1xf32, #tpu.memory_space<vmem>>, vector<32x1xf32>
    %15 = vector.broadcast %14 : vector<32x1xf32> to vector<32x256xf32>
    %16 = arith.mulf %13, %15 : vector<32x256xf32>
    %cst_15 = arith.constant dense<0.000000e+00> : vector<256xf32>
    %17 = vector.multi_reduction <add>, %16, %cst_15 [0] : vector<32x256xf32> to vector<256xf32>
    %18 = vector.shape_cast %17 : vector<256xf32> to vector<1x256xf32>
    %c0_16 = arith.constant 0 : index
    %c0_17 = arith.constant 0 : index
    %c0_18 = arith.constant 0 : index
    %19 = vector.load %arg8[%c0_16, %c0_17, %c0_18] : memref<1x1x256xf32, #tpu.memory_space<vmem>>, vector<1x1x256xf32>
    %20 = vector.shape_cast %19 : vector<1x1x256xf32> to vector<1x256xf32>
    %21 = vector.shape_cast %18 : vector<1x256xf32> to vector<1x1x256xf32>
    tpu.vector_store %arg8[%c0_16, %c0_17, %c0_18], %21 {strides = array<i32>} : memref<1x1x256xf32, #tpu.memory_space<vmem>>, vector<1x1x256xf32>,
    %c0_i32 = arith.constant 0 : i32
    %22 = arith.cmpi eq, %arg1, %c0_i32 : i32
    %23 = arith.extui %22 : i1 to i32
    %c0_i32_19 = arith.constant 0 : i32
    %24 = arith.cmpi ne, %23, %c0_i32_19 : i32
    scf.if %24 {
      %cst_34 = arith.constant 0.000000e+00 : f32
      %42 = vector.broadcast %cst_34 : f32 to vector<1x1x1xf32>
      %c0_35 = arith.constant 0 : index
      %c0_36 = arith.constant 0 : index
      %c0_37 = arith.constant 0 : index
      %43 = vector.load %arg9[%c0_35, %c0_36, %c0_37] : memref<1x1x1xf32, #tpu.memory_space<vmem>>, vector<1x1x1xf32>
      tpu.vector_store %arg9[%c0_35, %c0_36, %c0_37], %42 {strides = array<i32>} : memref<1x1x1xf32, #tpu.memory_space<vmem>>, vector<1x1x1xf32>,
      %cst_38 = arith.constant 0.000000e+00 : f32
      %44 = vector.broadcast %cst_38 : f32 to vector<1x1x1xf32>
      %c0_39 = arith.constant 0 : index
      %c0_40 = arith.constant 0 : index
      %c0_41 = arith.constant 0 : index
      %45 = vector.load %arg10[%c0_39, %c0_40, %c0_41] : memref<1x1x1xf32, #tpu.memory_space<vmem>>, vector<1x1x1xf32>
      tpu.vector_store %arg10[%c0_39, %c0_40, %c0_41], %44 {strides = array<i32>} : memref<1x1x1xf32, #tpu.memory_space<vmem>>, vector<1x1x1xf32>,
    } else {
    }
    %c0_20 = arith.constant 0 : index
    %c0_21 = arith.constant 0 : index
    %c0_22 = arith.constant 0 : index
    %25 = vector.load %arg9[%c0_20, %c0_21, %c0_22] : memref<1x1x1xf32, #tpu.memory_space<vmem>>, vector<1x1x1xf32>
    %26 = vector.shape_cast %25 : vector<1x1x1xf32> to vector<1x1xf32>
    %cst_23 = arith.constant dense<0.000000e+00> : vector<1xf32>
    %27 = vector.multi_reduction <add>, %18, %cst_23 [1] : vector<1x256xf32> to vector<1xf32>
    %28 = vector.shape_cast %27 : vector<1xf32> to vector<1x1xf32>
    %29 = arith.addf %26, %28 : vector<1x1xf32>
    %c0_24 = arith.constant 0 : index
    %c0_25 = arith.constant 0 : index
    %c0_26 = arith.constant 0 : index
    %30 = vector.load %arg9[%c0_24, %c0_25, %c0_26] : memref<1x1x1xf32, #tpu.memory_space<vmem>>, vector<1x1x1xf32>
    %31 = vector.shape_cast %30 : vector<1x1x1xf32> to vector<1x1xf32>
    %32 = vector.shape_cast %29 : vector<1x1xf32> to vector<1x1x1xf32>
    tpu.vector_store %arg9[%c0_24, %c0_25, %c0_26], %32 {strides = array<i32>} : memref<1x1x1xf32, #tpu.memory_space<vmem>>, vector<1x1x1xf32>,
    %c0_27 = arith.constant 0 : index
    %c0_28 = arith.constant 0 : index
    %c0_29 = arith.constant 0 : index
    %33 = vector.load %arg10[%c0_27, %c0_28, %c0_29] : memref<1x1x1xf32, #tpu.memory_space<vmem>>, vector<1x1x1xf32>
    %34 = vector.shape_cast %33 : vector<1x1x1xf32> to vector<1x1xf32>
    %35 = arith.mulf %18, %18 : vector<1x256xf32>
    %cst_30 = arith.constant dense<0.000000e+00> : vector<1xf32>
    %36 = vector.multi_reduction <add>, %35, %cst_30 [1] : vector<1x256xf32> to vector<1xf32>
    %37 = vector.shape_cast %36 : vector<1xf32> to vector<1x1xf32>
    %38 = arith.addf %34, %37 : vector<1x1xf32>
    %c0_31 = arith.constant 0 : index
    %c0_32 = arith.constant 0 : index
    %c0_33 = arith.constant 0 : index
    %39 = vector.load %arg10[%c0_31, %c0_32, %c0_33] : memref<1x1x1xf32, #tpu.memory_space<vmem>>, vector<1x1x1xf32>
    %40 = vector.shape_cast %39 : vector<1x1x1xf32> to vector<1x1xf32>
    %41 = vector.shape_cast %38 : vector<1x1xf32> to vector<1x1x1xf32>
    tpu.vector_store %arg10[%c0_31, %c0_32, %c0_33], %41 {strides = array<i32>} : memref<1x1x1xf32, #tpu.memory_space<vmem>>, vector<1x1x1xf32>,
    return
  }
  func.func @transform_0(%arg0: i32, %arg1: i32) -> (i32, i32, i32) {
    %c0_i32 = arith.constant 0 : i32
    %c0_i32_0 = arith.constant 0 : i32
    return %arg0, %c0_i32, %arg1 : i32, i32, i32
  }
  func.func @transform_1(%arg0: i32, %arg1: i32) -> (i32, i32, i32) {
    %c0_i32 = arith.constant 0 : i32
    %c0_i32_0 = arith.constant 0 : i32
    return %arg0, %c0_i32, %arg1 : i32, i32, i32
  }
  func.func @transform_2(%arg0: i32, %arg1: i32) -> (i32, i32) {
    %c0_i32 = arith.constant 0 : i32
    %c0_i32_0 = arith.constant 0 : i32
    %c0_i32_1 = arith.constant 0 : i32
    return %c0_i32, %c0_i32_0 : i32, i32
  }
  func.func @transform_3(%arg0: i32, %arg1: i32) -> (i32, i32) {
    %c0_i32 = arith.constant 0 : i32
    %c0_i32_0 = arith.constant 0 : i32
    %c0_i32_1 = arith.constant 0 : i32
    return %c0_i32, %c0_i32_0 : i32, i32
  }
  func.func @transform_4(%arg0: i32, %arg1: i32) -> (i32, i32) {
    %c0_i32 = arith.constant 0 : i32
    %c0_i32_0 = arith.constant 0 : i32
    %c0_i32_1 = arith.constant 0 : i32
    return %c0_i32, %c0_i32_0 : i32, i32
  }
  func.func @transform_5(%arg0: i32, %arg1: i32) -> (i32, i32) {
    %c0_i32 = arith.constant 0 : i32
    %c0_i32_0 = arith.constant 0 : i32
    %c0_i32_1 = arith.constant 0 : i32
    return %c0_i32, %c0_i32_0 : i32, i32
  }
  func.func @transform_6(%arg0: i32, %arg1: i32) -> (i32, i32, i32) {
    %c0_i32 = arith.constant 0 : i32
    %c0_i32_0 = arith.constant 0 : i32
    return %arg0, %c0_i32, %arg1 : i32, i32, i32
  }
  func.func @transform_7(%arg0: i32, %arg1: i32) -> (i32, i32, i32) {
    %c0_i32 = arith.constant 0 : i32
    %c0_i32_0 = arith.constant 0 : i32
    %c0_i32_1 = arith.constant 0 : i32
    return %arg0, %c0_i32, %c0_i32_0 : i32, i32, i32
  }
  func.func @transform_8(%arg0: i32, %arg1: i32) -> (i32, i32, i32) {
    %c0_i32 = arith.constant 0 : i32
    %c0_i32_0 = arith.constant 0 : i32
    %c0_i32_1 = arith.constant 0 : i32
    return %arg0, %c0_i32, %c0_i32_0 : i32, i32, i32
  }
}

module attributes {stable_mosaic.version = 11 : i64} {
  func.func @_gate_kernel(%arg0: i32, %arg1: i32, %arg2: memref<1x4x256xf32, #tpu.memory_space<vmem>>, %arg3: memref<1x1x256xf32, #tpu.memory_space<vmem>>, %arg4: memref<2xf32, #tpu.memory_space<smem>>, %arg5: memref<1x4x256xf32, #tpu.memory_space<vmem>>) attributes {dimension_semantics = [#tpu.dimension_semantics<parallel>, #tpu.dimension_semantics<parallel>], iteration_bounds = array<i64: 2, 1>, scalar_prefetch = 0 : i64, scratch_operands = 0 : i64, tpu.core_type = #tpu.core_type<tc>, window_params = [{transform_indices = @transform_0, window_bounds = array<i64: 1, 4, 256>}, {transform_indices = @transform_1, window_bounds = array<i64: 1, 1, 256>}, {transform_indices = @transform_2, window_bounds = array<i64: 2>}, {transform_indices = @transform_3, window_bounds = array<i64: 1, 4, 256>}]} {
    %c0 = arith.constant 0 : index
    %0 = memref.load %arg4[%c0] : memref<2xf32, #tpu.memory_space<smem>>
    %c1 = arith.constant 1 : index
    %1 = memref.load %arg4[%c1] : memref<2xf32, #tpu.memory_space<smem>>
    %c0_0 = arith.constant 0 : index
    %c0_1 = arith.constant 0 : index
    %c0_2 = arith.constant 0 : index
    %2 = vector.load %arg3[%c0_0, %c0_1, %c0_2] : memref<1x1x256xf32, #tpu.memory_space<vmem>>, vector<1x1x256xf32>
    %3 = vector.shape_cast %2 : vector<1x1x256xf32> to vector<1x256xf32>
    %4 = vector.broadcast %0 : f32 to vector<1x256xf32>
    %5 = arith.mulf %3, %4 : vector<1x256xf32>
    %6 = vector.broadcast %1 : f32 to vector<1x256xf32>
    %7 = arith.addf %5, %6 : vector<1x256xf32>
    %8 = arith.negf %7 : vector<1x256xf32>
    %9 = math.exp %8 : vector<1x256xf32>
    %cst = arith.constant 1.000000e+00 : f32
    %10 = vector.broadcast %cst : f32 to vector<1x256xf32>
    %11 = arith.addf %10, %9 : vector<1x256xf32>
    %12 = arith.divf %10, %11 : vector<1x256xf32>
    %c0_3 = arith.constant 0 : index
    %c0_4 = arith.constant 0 : index
    %c0_5 = arith.constant 0 : index
    %13 = vector.load %arg2[%c0_3, %c0_4, %c0_5] : memref<1x4x256xf32, #tpu.memory_space<vmem>>, vector<1x4x256xf32>
    %14 = vector.shape_cast %13 : vector<1x4x256xf32> to vector<4x256xf32>
    %15 = vector.broadcast %12 : vector<1x256xf32> to vector<4x256xf32>
    %16 = arith.mulf %14, %15 : vector<4x256xf32>
    %c0_6 = arith.constant 0 : index
    %c0_7 = arith.constant 0 : index
    %c0_8 = arith.constant 0 : index
    %17 = vector.load %arg5[%c0_6, %c0_7, %c0_8] : memref<1x4x256xf32, #tpu.memory_space<vmem>>, vector<1x4x256xf32>
    %18 = vector.shape_cast %17 : vector<1x4x256xf32> to vector<4x256xf32>
    %19 = vector.shape_cast %16 : vector<4x256xf32> to vector<1x4x256xf32>
    tpu.vector_store %arg5[%c0_6, %c0_7, %c0_8], %19 {strides = array<i32>} : memref<1x4x256xf32, #tpu.memory_space<vmem>>, vector<1x4x256xf32>,
    return
  }
  func.func @transform_0(%arg0: i32, %arg1: i32) -> (i32, i32, i32) {
    %c0_i32 = arith.constant 0 : i32
    %c0_i32_0 = arith.constant 0 : i32
    return %arg0, %c0_i32, %arg1 : i32, i32, i32
  }
  func.func @transform_1(%arg0: i32, %arg1: i32) -> (i32, i32, i32) {
    %c0_i32 = arith.constant 0 : i32
    %c0_i32_0 = arith.constant 0 : i32
    return %arg0, %c0_i32, %arg1 : i32, i32, i32
  }
  func.func @transform_2(%arg0: i32, %arg1: i32) -> i32 {
    %c0_i32 = arith.constant 0 : i32
    %c0_i32_0 = arith.constant 0 : i32
    return %c0_i32 : i32
  }
  func.func @transform_3(%arg0: i32, %arg1: i32) -> (i32, i32, i32) {
    %c0_i32 = arith.constant 0 : i32
    %c0_i32_0 = arith.constant 0 : i32
    return %arg0, %c0_i32, %arg1 : i32, i32, i32
  }
}

</mosaic_0001>

<bundles_post_ra>
// kernel: attention_block.3
= control target key start
LH: loop header
LB: loop body
LE: loop exit
PB: predicated region body
PF: predicated region fallthrough
CT: control target
= control target key end

     0   :  { %s778_s18 = smov 0   ;;  %s780_s19 = smov 0   ;;  %s846_s0 = inlined_call_operand.vmem [shape: f32[2,4,256], index: 0, kind: input, shape index: {}]   ;;  %s847_s1 = inlined_call_operand.vmem [shape: f32[2,4,256], index: 1, kind: input, shape index: {}]   ;;  %s848_s2 = inlined_call_operand.vmem [shape: f32[2,4,4], index: 2, kind: output, shape index: {0}]   ;;  %s849_s3 = inlined_call_operand.vmem [shape: f32[2,4,1], index: 3, kind: output, shape index: {1}]   ;;  %s850_s4 = inlined_call_operand.vmem [shape: f32[2,4,4], index: 4, kind: output, shape index: {2}]   ;;  %s851_s5 = inlined_call_operand.vmem [shape: f32[2,4,1], index: 5, kind: output, shape index: {3}]  }
   0x1   :  { %s782_s20 = smov 0  }
   0x2 LB: > { %s28_s21 = sadd.s32 1, %s741_s19  ;;  %p683_p0 = scmp.ge.s32.totalorder %s745_s20, 1  ;;  %s745_s20 = sphi %s782_s20, %s16_s20   ;;  %s741_s19 = sphi %s780_s19, %s853_s19   ;;  %s737_s18 = sphi %s778_s18, %s852_s18  }
   0x3   : > { %p30_p1 = scmp.ge.s32.totalorder %s28_s21, 2  ;;  %p230_p2 = scmp.lt.s32.totalorder %s745_s20, 3 }
   0x5   : > { %s855_s21 = smov (%p30_p1, %s28_s21), 0  ;;  %p231_p3 = pnand %p683_p0, %p230_p2 }
   0x6   : > { %p283_p4 = scmp.lt.s32.totalorder (!%p231_p3), %s737_s18, 1 }
   0x7   : > { %234 = sbr.rel (%p231_p3) target bundleno = 219 (0xdb), region = 28 }
   0xc   : > { %s857_s18 = smov (!%p283_p4, %s737_s18), 1  ;;  %vm408_vm0 = vcmask 1043456   ;;  %vm324_vm1 = vcmask 3072   ;;  %v747_v5 = vmov 0.0   ;;  %vm322_vm2 = vcmask 27648  }
   0xd   : > { %s694_s22 = sshll.u32 %s857_s18, 3  ;;  %s796_s23 = sshll.u32 %s857_s18, 2 }
   0xe   : > { %s290_s26 = scalar_lea.vmem %s846_s0, %s694_s22  ;;  %s300_s29 = scalar_lea.vmem %s847_s1, %s694_s22 }
   0xf   : > { %v328_v0 = vld [vmem:[%s290_s26] sm:$0xff]  ;;  %s808_s7 = scalar_lea.vmem %s849_s3, %s796_s23  ;;  %s313_s10 = scalar_lea.vmem %s850_s4, %s796_s23 }
  0x10   : > { %v329_v1 = vld [vmem:[%s300_s29] sm:$0xff]  ;;  %v332_v2 = vcombine.high %v328_v0, %v328_v0  ;;  %v409_v4 = vsel %vm408_vm0, %v328_v0, 0.0  ;;  %325 = vst.msk [vmem:[%s808_s7] sm:$0xf] %vm324_vm1, %v747_v5  ;;  %s317_s13 = scalar_lea.vmem %s851_s5, %s796_s23  ;;  %s305_s16 = scalar_lea.vmem %s848_s2, %s796_s23 }
  0x11   : > { %v419_v3 = vcombine.high %v329_v1, %v329_v1  ;;  %v494_v7 = vsel %vm408_vm0, %v329_v1, 0.0  ;;  %326 = vst.msk [vmem:[%s313_s10] sm:$0xf] %vm322_vm2, %v747_v5  ;;  %323 = vst.msk [vmem:[%s305_s16] sm:$0xf] %vm322_vm2, %v747_v5 }
  0x12   : > { %364 = vmatprep.subr.mxu0 %v332_v2  ;;  %v410_v6 = vsel %vm408_vm0, %v332_v2, 0.0  ;;  %398 = vmatprep.mubr.f32.mxu0 %v332_v2  ;;  %327 = vst.msk [vmem:[%s317_s13] sm:$0xf] %vm324_vm1, %v747_v5 }
  0x13   : > { %451 = vmatprep.subr.mxu1 %v419_v3  ;;  %v495_v8 = vsel %vm408_vm0, %v419_v3, 0.0  ;;  %365 = vmatpush1.xpose.msra.mxu0 %v328_v0  ;;  %v411_v9 = vadd.f32 %v410_v6, %v409_v4 }
  0x14   : > { %452 = vmatpush1.xpose.msra.mxu1 %v329_v1  ;;  %485 = vmatprep.mubr.f32.mxu1 %v419_v3  ;;  %v496_v10 = vadd.f32 %v495_v8, %v494_v7 }
  0x15   : > { %412 = vadd.xlane.f32.xlu0 %v411_v9 }
  0x16   : > { %399 = vmatmul.mubr.f32.vlgmr.msra.gmra.mxu0 %v328_v0 }
  0x17   : > { %486 = vmatmul.mubr.f32.vlgmr.msra.gmra.mxu1 %v329_v1  ;;  %v407_v11 = vld [vmem:[%s808_s7] sm:$0xf] }
  0x18   : > { %v417_v17 = vld [vmem:[%s313_s10] sm:$0xf] }
  0x19   : > { %497 = vadd.xlane.f32.xlu0 %v496_v10  ;;  %v493_v14 = vld [vmem:[%s317_s13] sm:$0xf] }
  0x1a   : > { %v330_v18 = vld [vmem:[%s305_s16] sm:$0xf] }
  0x9e   : > { %v413_v12 = vpop.xlane.xlu0 %412 }
  0x9f   : > { %v414_v13 = vadd.f32 %v413_v12, %v407_v11 }
  0xa1   : > { %416 = vst.msk [vmem:[%s808_s7] sm:$0xf] %vm324_vm1, %v414_v13 }
  0xa2   : > { %v498_v15 = vpop.xlane.xlu0 %497 }
  0xa3   : > { %v499_v16 = vadd.f32 %v498_v15, %v493_v14 }
  0xa5   : > { %500 = vst.msk [vmem:[%s317_s13] sm:$0xf] %vm324_vm1, %v499_v16 }
  0xd6   : > { %v400_v20 = vpop.f32.mrf.mxu0 }
  0xd7   : > { %v487_v19 = vpop.f32.mrf.mxu1  ;;  %v404_v22 = vadd.f32 %v400_v20, %v330_v18 }
  0xd8   : > { %v491_v21 = vadd.f32 %v487_v19, %v417_v17  ;;  %v402_v23 = vpop.f32.mrf.mxu0 }
  0xd9   : > { %v489_v24 = vpop.f32.mrf.mxu1  ;;  %406 = vst.msk [vmem:[%s305_s16] sm:$0xf] %vm322_vm2, %v404_v22 }
  0xda   : > { %492 = vst.msk [vmem:[%s313_s10] sm:$0xf] %vm322_vm2, %v491_v21 }
  0xdb PF: > { %s16_s20 = sadd.s32 1, %s745_s20   ;;  %s852_s18 = smov %s741_s19 }
  0xdc   : > { %p13_p5 = scmp.ge.s32.totalorder %s16_s20, 4   ;;  %s853_s19 = smov %s855_s21 }
  0xde   :  { %15 = sbr.rel (!%p13_p5) target bundleno = 2 (0x2), region = 101 }

// kernel: attention_block.4
= control target key start
LH: loop header
LB: loop body
LE: loop exit
PB: predicated region body
PF: predicated region fallthrough
CT: control target
= control target key end

     0   :  { %s1035_s27 = smov 0   ;;  %s1037_s28 = smov 0   ;;  %s1158_s0 = inlined_call_operand.vmem [shape: f32[2,4,256], index: 0, kind: input, shape index: {}]   ;;  %s1159_s1 = inlined_call_operand.vmem [shape: f32[2,4,256], index: 1, kind: input, shape index: {}]   ;;  %s1160_s2 = inlined_call_operand.vmem [shape: f32[32,4], index: 2, kind: input, shape index: {}]   ;;  %s1161_s3 = inlined_call_operand.vmem [shape: f32[32,4], index: 3, kind: input, shape index: {}]   ;;  %s1162_s4 = inlined_call_operand.vmem [shape: f32[32,1], index: 4, kind: input, shape index: {}]   ;;  %s1163_s5 = inlined_call_operand.vmem [shape: f32[32,1], index: 5, kind: input, shape index: {}]   ;;  %s1164_s6 = inlined_call_operand.vmem [shape: f32[2,1,256], index: 6, kind: output, shape index: {0}]   ;;  %s1165_s7 = inlined_call_operand.vmem [shape: f32[2,1,1], index: 7, kind: output, shape index: {1}]   ;;  %s1166_s8 = inlined_call_operand.vmem [shape: f32[2,1,1], index: 8, kind: output, shape index: {2}]  }
   0x1   :  { %s1039_s29 = smov 0  }
   0x2 LB: > { %s31_s30 = sadd.s32 1, %s981_s28  ;;  %p910_p0 = scmp.ge.s32.totalorder %s985_s29, 1  ;;  %s985_s29 = sphi %s1039_s29, %s19_s29   ;;  %s981_s28 = sphi %s1037_s28, %s1168_s28   ;;  %s977_s27 = sphi %s1035_s27, %s1167_s27  }
   0x3   : > { %p33_p1 = scmp.ge.s32.totalorder %s31_s30, 2  ;;  %p305_p2 = scmp.lt.s32.totalorder %s985_s29, 3 }
   0x5   : > { %s1170_s30 = smov (%p33_p1, %s31_s30), 0  ;;  %p306_p3 = pnand %p910_p0, %p305_p2 }
   0x6   : > { %p362_p4 = scmp.lt.s32.totalorder (!%p306_p3), %s977_s27, 1 }
   0x7   : > { %309 = sbr.rel (%p306_p3) target bundleno = 396 (0x18c), region = 44 }
   0xc   : > { %v987_v0 = vmov 0.0   ;;  %s1172_s27 = smov (!%p362_p4, %s977_s27), 1  ;;  %v988_v1 = vmov 0   ;;  %v622_v2 = vld [vmem:[%s1162_s4] sm:$0xff]  ;;  %v624_v3 = vld [vmem:[%s1162_s4 + $0x10] sm:$0xff]  ;;  %v623_v4 = vld [vmem:[%s1162_s4 + $0x8] sm:$0xff] }
   0xd   : > { %490 = vmatprep.mubr.f32.mxu0 %v987_v0  ;;  %597 = vmatprep.mubr.f32.mxu1 %v987_v0  ;;  %s930_s13 = sshll.u32 %s1172_s27, 3  ;;  %v625_v5 = vld [vmem:[%s1162_s4 + $0x18] sm:$0xff]  ;;  %vm421_vm0 = vcmask 1043456   ;;  %v401_v10 = vld [vmem:[%s1161_s3] sm:$0xff]  ;;  %vm408_vm1 = vcmask 31744   ;;  %v663_v13 = vld [vmem:[%s1163_s5 + $0x8] sm:$0xff]  ;;  %s1130_s14 = scalar_lea.vmem %s1165_s7, %s1172_s27 }
   0xe   : > { %959 = vset.pattern.permute.xlu0 %v988_v1  ;;  %960 = vset.pattern.permute.xlu1 %v988_v1  ;;  %s379_s16 = scalar_lea.vmem %s1159_s1, %s930_s13  ;;  %s369_s23 = scalar_lea.vmem %s1158_s0, %s930_s13  ;;  %v396_v11 = vld [vmem:[%s1160_s2] sm:$0xff]  ;;  %v402_v14 = vld [vmem:[%s1161_s3 + $0x8] sm:$0xff]  ;;  %v664_v16 = vld [vmem:[%s1163_s5 + $0x10] sm:$0xff]  ;;  %vm739_vm2 = vcmask 0  }
   0xf   : > { %628 = vperm.xlu0 %959, %v622_v2   ;;  %638 = vperm.xlu1 %960, %v624_v3   ;;  %v405_v6 = vld [vmem:[%s379_s16] sm:$0xff]  ;;  %v397_v15 = vld [vmem:[%s1160_s2 + $0x8] sm:$0xff]  ;;  %v665_v17 = vld [vmem:[%s1163_s5 + $0x18] sm:$0xff]  ;;  %740 = vst.msk [vmem:[%s1130_s14] sm:$0x1] %vm739_vm2, %v987_v0  ;;  %s915_s15 = sshll.u32 %s1172_s27, 1  ;;  %s395_s21 = scalar_lea.vmem %s1166_s8, %s1172_s27 }
  0x10   : > { %v407_v7 = vcombine.high %v405_v6, %v405_v6  ;;  %v400_v8 = vld [vmem:[%s369_s23] sm:$0xff]  ;;  %v403_v18 = vld [vmem:[%s1161_s3 + $0x10] sm:$0xff]  ;;  %v404_v20 = vld [vmem:[%s1161_s3 + $0x18] sm:$0xff]  ;;  %s388_s18 = scalar_lea.vmem %s1164_s6, %s915_s15  ;;  %741 = vst.msk [vmem:[%s395_s21] sm:$0x1] %vm739_vm2, %v987_v0 }
  0x11   : > { %v516_v9 = vcombine.high %v400_v8, %v400_v8  ;;  %v662_v12 = vld [vmem:[%s1163_s5] sm:$0xff]  ;;  %v398_v19 = vld [vmem:[%s1160_s2 + $0x10] sm:$0xff]  ;;  %v399_v21 = vld [vmem:[%s1160_s2 + $0x18] sm:$0xff] }
  0x12   : > { %916 = vmatprep.subr.msk.mxu0 %vm421_vm0, %v407_v7 }
  0x13   : > { %633 = vperm.xlu0 %959, %v623_v4   ;;  %643 = vperm.xlu1 %960, %v625_v5  }
  0x14   : > { %922 = vmatprep.subr.msk.mxu1 %vm421_vm0, %v516_v9  ;;  %917 = vmatpush1.msk.msra.mxu0 %vm421_vm0, %v405_v6 }
  0x15   : > { %923 = vmatpush1.msk.msra.mxu1 %vm421_vm0, %v400_v8  ;;  %918 = vmatmul.mubr.msk.f32.vlgmr.msra.gmra.mxu0 %vm408_vm1, %v401_v10 }
  0x16   : > { %924 = vmatmul.mubr.msk.f32.vlgmr.msra.gmra.mxu1 %vm408_vm1, %v396_v11  ;;  %496 = vmatprep.mubr.f32.mxu0 %v987_v0 }
  0x17   : > { %603 = vmatprep.mubr.f32.mxu1 %v987_v0  ;;  %668 = vperm.xlu0 %959, %v662_v12  }
  0x18   : > { %673 = vperm.xlu1 %960, %v663_v13  }
  0x19   : > { %919 = vmatmul.mubr.msk.f32.gmra.mxu0 %vm408_vm1, %v402_v14 }
  0x1a   : > { %925 = vmatmul.mubr.msk.f32.gmra.mxu1 %vm408_vm1, %v397_v15  ;;  %502 = vmatprep.mubr.f32.mxu0 %v987_v0 }
  0x1b   : > { %609 = vmatprep.mubr.f32.mxu1 %v987_v0  ;;  %678 = vperm.xlu0 %959, %v664_v16  }
  0x1c   : > { %683 = vperm.xlu1 %960, %v665_v17  }
  0x1d   : > { %920 = vmatmul.mubr.msk.f32.gmra.mxu0 %vm408_vm1, %v403_v18 }
  0x1e   : > { %926 = vmatmul.mubr.msk.f32.gmra.mxu1 %vm408_vm1, %v398_v19  ;;  %508 = vmatprep.mubr.f32.mxu0 %v987_v0 }
  0x1f   : > { %615 = vmatprep.mubr.f32.mxu1 %v987_v0 }
  0x21   : > { %921 = vmatmul.mubr.msk.f32.gmra.mxu0 %vm408_vm1, %v404_v20 }
  0x22   : > { %927 = vmatmul.mubr.msk.f32.gmra.mxu1 %vm408_vm1, %v399_v21 }
  0x8a   : > { %v629_v22 = vpop.permute.xlu0 %628  ;;  %v639_v25 = vpop.permute.xlu1 %638 }
  0x8e   : > { %v634_v28 = vpop.permute.xlu0 %633  ;;  %v644_v36 = vpop.permute.xlu1 %643 }
  0x92   : > { %v669_v42 = vpop.permute.xlu0 %668 }
  0x93   : > { %v674_v56 = vpop.permute.xlu1 %673 }
  0x96   : > { %v679_v63 = vpop.permute.xlu0 %678 }
  0x97   : > { %v684_v13 = vpop.permute.xlu1 %683 }
  0xd5   : > { %v492_v23 = vpop.f32.mrf.mxu0 }
  0xd6   : > { %v599_v24 = vpop.f32.mrf.mxu1 }
  0xd7   : > { %v494_v26 = vpop.f32.mrf.mxu0  ;;  %v600_v30 = vadd.f32 %v599_v24, %v492_v23 }
  0xd8   : > { %v601_v27 = vpop.f32.mrf.mxu1 }
  0xd9   : > { %v498_v29 = vpop.f32.mrf.mxu0  ;;  %v602_v32 = vadd.f32 %v601_v27, %v494_v26  ;;  %v646_v40 = vadd.f32 %v629_v22, %v600_v30  ;;  %v718_v27 = vlaneseq }
  0xda   : > { %v605_v31 = vpop.f32.mrf.mxu1 }
  0xdb   : > { %v606_v33 = vadd.f32 %v605_v31, %v498_v29  ;;  %v500_v34 = vpop.f32.mrf.mxu0  ;;  %v647_v43 = vadd.f32 %v629_v22, %v602_v32  ;;  %v654_v53 = vmax.f32 %v646_v40, 0.0  ;;  %vm732_vm3 = vcmp.lt.s32.totalorder %v718_v27, 256 }
  0xdc   : > { %v607_v35 = vpop.f32.mrf.mxu1 }
  0xdd   : > { %v648_v37 = vadd.f32 %v634_v28, %v606_v33  ;;  %v608_v38 = vadd.f32 %v607_v35, %v500_v34  ;;  %v504_v39 = vpop.f32.mrf.mxu0  ;;  %v655_v55 = vmax.f32 %v647_v43, 0.0  ;;  %v686_v4 = vmul.f32 %v669_v42, %v654_v53 }
  0xde   : > { %v611_v41 = vpop.f32.mrf.mxu1  ;;  %v719_v33 = vshrl.u32 %v718_v27, 7 }
  0xdf   : > { %v649_v44 = vadd.f32 %v634_v28, %v608_v38  ;;  %v612_v45 = vadd.f32 %v611_v41, %v504_v39  ;;  %v506_v46 = vpop.f32.mrf.mxu0  ;;  %v656_v47 = vmax.f32 %v648_v37, 0.0  ;;  %v687_v7 = vmul.f32 %v669_v42, %v655_v55 }
  0xe0   : > { %v613_v48 = vpop.f32.mrf.mxu1 }
  0xe1   : > { %v657_v49 = vmax.f32 %v649_v44, 0.0  ;;  %v650_v50 = vadd.f32 %v639_v25, %v612_v45  ;;  %v614_v51 = vadd.f32 %v613_v48, %v506_v46  ;;  %v510_v52 = vpop.f32.mrf.mxu0  ;;  %v688_v60 = vmul.f32 %v674_v56, %v656_v47  ;;  %v742_v46 = vld [vmem:[%s1130_s14] sm:$0x1] }
  0xe2   : > { %v617_v54 = vpop.f32.mrf.mxu1  ;;  %v749_v48 = vld [vmem:[%s395_s21] sm:$0x1] }
  0xe3   : > { %v658_v57 = vmax.f32 %v650_v50, 0.0  ;;  %v651_v58 = vadd.f32 %v639_v25, %v614_v51  ;;  %v512_v59 = vpop.f32.mrf.mxu0  ;;  %v618_v61 = vadd.f32 %v617_v54, %v510_v52  ;;  %v689_v1 = vmul.f32 %v674_v56, %v657_v49 }
  0xe4   : > { %v619_v62 = vpop.f32.mrf.mxu1  ;;  %v694_v10 = vadd.f32 %v688_v60, %v686_v4  ;;  %v989_v25 = vmov 1966171168  }
  0xe5   : > { %v659_v2 = vmax.f32 %v651_v58, 0.0  ;;  %v620_v3 = vadd.f32 %v619_v62, %v512_v59  ;;  %v690_v5 = vmul.f32 %v679_v63, %v658_v57  ;;  %v652_v6 = vadd.f32 %v644_v36, %v618_v61 }
  0xe6   : > { %v703_v12 = vadd.f32 %v689_v1, %v687_v7  ;;  %v716_v26 = vunpack.c.l.s4 %v989_v25 }
  0xe7   : > { %v691_v8 = vmul.f32 %v679_v63, %v659_v2  ;;  %v653_v9 = vadd.f32 %v644_v36, %v620_v3  ;;  %v660_v11 = vmax.f32 %v652_v6, 0.0  ;;  %v695_v15 = vadd.f32 %v694_v10, %v690_v5 }
  0xe8   : > { %v717_v32 = vunpack.c.0.s8 %v716_v26 }
  0xe9   : > { %v661_v14 = vmax.f32 %v653_v9, 0.0  ;;  %v692_v16 = vmul.f32 %v684_v13, %v660_v11  ;;  %v704_v17 = vadd.f32 %v703_v12, %v691_v8 }
  0xea   : > { %v720_v38 = vsub.s32 %v717_v32, %v719_v33 }
  0xeb   : > { %v693_v18 = vmul.f32 %v684_v13, %v661_v14  ;;  %v696_v19 = vadd.f32 %v695_v15, %v692_v16 }
  0xed   : > { %v705_v20 = vadd.f32 %v704_v17, %v693_v18  ;;  %v697_v21 = vrot.slane %v696_v19, 4 }
  0xef   : > { %v706_v22 = vrot.slane %v705_v20, 4  ;;  %v698_v23 = vadd.f32 %v697_v21, %v696_v19 }
  0xf1   : > { %v707_v24 = vadd.f32 %v706_v22, %v705_v20  ;;  %v699_v28 = vrot.slane %v698_v23, 2 }
  0xf3   : > { %v708_v29 = vrot.slane %v707_v24, 2  ;;  %v700_v30 = vadd.f32 %v699_v28, %v698_v23 }
  0xf5   : > { %v709_v31 = vadd.f32 %v708_v29, %v707_v24  ;;  %v701_v34 = vrot.slane %v700_v30, 1 }
  0xf7   : > { %v710_v35 = vrot.slane %v709_v31, 1  ;;  %v702_v36 = vadd.f32 %v701_v34, %v700_v30 }
  0xf9   : > { %v711_v37 = vadd.f32 %v710_v35, %v709_v31  ;;  %v750_v41 = vmul.f32 %v702_v36, %v702_v36 }
  0xfb   : > { %v743_v39 = vadd.f32 %v711_v37, %v702_v36  ;;  %v714_v40 = vcombine.low %v702_v36, %v711_v37  ;;  %v751_v42 = vmul.f32 %v711_v37, %v711_v37 }
  0xfd   : > { %744 = vadd.xlane.f32.xlu0 %v743_v39  ;;  %v721_v43 = vrot.slane %v714_v40, %v720_v38  ;;  %v752_v44 = vadd.f32 %v751_v42, %v750_v41 }
  0xff   : > { %v728_v45 = vrot.slane %v721_v43, %v720_v38  ;;  %753 = vadd.xlane.f32.xlu1 %v752_v44 }
 0x101   : > { %734 = vst.msk [vmem:[%s388_s18] sm:$0x3] %vm732_vm3, %v728_v45 }
 0x186   : > { %v745_v47 = vpop.xlane.xlu0 %744 }
 0x187   : > { %v746_v49 = vadd.f32 %v745_v47, %v742_v46 }
 0x188   : > { %v754_v50 = vpop.xlane.xlu1 %753 }
 0x189   : > { %748 = vst.msk [vmem:[%s1130_s14] sm:$0x1] %vm739_vm2, %v746_v49  ;;  %v755_v51 = vadd.f32 %v754_v50, %v749_v48 }
 0x18b   : > { %756 = vst.msk [vmem:[%s395_s21] sm:$0x1] %vm739_vm2, %v755_v51 }
 0x18c PF: > { %s19_s29 = sadd.s32 1, %s985_s29   ;;  %s1167_s27 = smov %s981_s28 }
 0x18d   : > { %p16_p5 = scmp.ge.s32.totalorder %s19_s29, 4   ;;  %s1168_s28 = smov %s1170_s30 }
 0x18f   :  { %18 = sbr.rel (!%p16_p5) target bundleno = 2 (0x2), region = 105 }

// kernel: attention_block.5
= control target key start
LH: loop header
LB: loop body
LE: loop exit
PB: predicated region body
PF: predicated region fallthrough
CT: control target
= control target key end

     0   :  { %8 = vsyncpa [#allocation3], 0  ;;  %s519_s12 = smov 0   ;;  %s521_s13 = smov 0   ;;  %s581_s0 = inlined_call_operand.vmem [shape: f32[2,4,256], index: 0, kind: input, shape index: {}]   ;;  %s582_s1 = inlined_call_operand.vmem [shape: f32[2,1,256], index: 1, kind: input, shape index: {}]   ;;  %s583_s2 = inlined_call_operand.vmem [shape: f32[2], index: 2, kind: input, shape index: {}]   ;;  %s584_s3 = inlined_call_operand.vmem [shape: f32[2,4,256], index: 3, kind: output, shape index: {}]  }
   0x1   :  { %s523_s14 = smov 0  }
   0x2 LB: > { %s398_s15 = sadd.s32 4294967295, %s496_s14   ;;  %s26_s16 = sadd.s32 1, %s492_s13  ;;  %s496_s14 = sphi %s523_s14, %s14_s14   ;;  %s492_s13 = sphi %s521_s13, %s588_s13   ;;  %s488_s12 = sphi %s519_s12, %s587_s12  }
   0x3   : > { %p28_p0 = scmp.ge.s32.totalorder %s26_s16, 2  ;;  %p400_p1 = scmp.ge.s32.totalorder %s496_s14, 1 }
   0x4   : > { %p136_p2 = scmp.lt.s32.totalorder %s496_s14, 3  ;;  %p544_p4 = scmp.eq.s32.totalorder %s398_s15, 0 }
   0x5   : > { %s590_s16 = smov (%p28_p0, %s26_s16), 0  ;;  %s149_s21 = sshll.u32 %s583_s2, 4  ;;  %s150_s21 = int_to_ptr.vmem [resolvable:$true] %s149_s21 }
   0x6   : > { %p540_p3 = pnand %p400_p1, %p136_p2  ;;  %s455_s22 = scalar_lea.vmem %s150_s21, 16 }
   0x7   : > { %p456_p7 = scmp.ne.s32.totalorder %s150_s21, %s455_s22  ;;  %p463_p11 = scmp.lt.s32.totalorder %s150_s21, %s150_s21 }
   0x8   : > { %p420_p5 = pneg %p540_p3  ;;  %p464_p12 = scmp.lt.s32.totalorder %s455_s22, %s455_s22 }
   0xa   : > { %p421_p6 = pnand %p544_p4, %p420_p5  ;;  %p465_p13 = por %p464_p12, %p463_p11 }
   0xc   : > { %p457_p8 = pneg %p421_p6 }
   0xe   : > { %p458_p9 = pnand %p457_p8, %p456_p7 }
  0x10   : > { %p459_p10 = pneg %p458_p9 }
  0x12   : > { %p466_p0 = pnand %p465_p13, %p459_p10 }
  0x14   : > { %469 = shalt.err (!%p466_p0)
}
  0x15   : > { %s498_s23 = smov [#allocation2]   ;;  %187 = sbr.rel (%p540_p3) target bundleno = 79 (0x4f), region = 32 }
  0x16   : > { %423 = dma.vmem_to_smem (!%p421_p6), %s150_s21, 16, %s498_s23, [#allocation3]  }
  0x1a   : > { %483 = dma.done.wait (%p544_p4), [#allocation3], 16  }
  0x1b   : > { %485 = vsyncadd (%p544_p4), [#allocation3], 4294967280 }
  0x1c   : > { %193 = sfence }
  0x1d   : > { %p229_p1 = scmp.lt.s32.totalorder %s488_s12, 1  ;;  %s257_s24 = sld [smem:[#allocation2]]  ;;  %v272_v8 = vlaneseq }
  0x1e   : > { %s410_s25 = sld [smem:[#allocation2 + $0x1]] }
  0x1f   : > { %s592_s12 = smov (!%p229_p1, %s488_s12), 1  ;;  %v273_v9 = vshrl.u32 %v272_v8, 7 }
  0x20   : > { %s407_s26 = sshll.u32 %s592_s12, 1  ;;  %s414_s30 = sshll.u32 %s592_s12, 3 }
  0x21   : > { %s245_s29 = scalar_lea.vmem %s582_s1, %s407_s26  ;;  %v274_v10 = vsub.s32 0, %v273_v9  ;;  %v278_v11 = vsub.s32 1, %v273_v9  ;;  %s236_s6 = scalar_lea.vmem %s581_s0, %s414_s30 }
  0x22   : > { %v259_v0 = vld [vmem:[%s245_s29] sm:$0x3]  ;;  %s255_s9 = scalar_lea.vmem %s584_s3, %s414_s30 }
  0x23   : > { %v260_v1 = vstv %s257_s24  ;;  %v270_v15 = vld [vmem:[%s236_s6] sm:$0xff] }
  0x24   : > { %v261_v2 = vmul.f32 %v260_v1, %v259_v0  ;;  %v262_v3 = vstv %s410_s25 }
  0x26   : > { %v263_v4 = vadd.f32 %v262_v3, %v261_v2 }
  0x28   : > { %v411_v5 = vmul.f32 -1.442695, %v263_v4 }
  0x2a   : > { %451 = vpow2.f32 %v411_v5 }
  0x37   : > { %v452_v6 = vpop.eup %451 }
  0x38   : > { %v267_v7 = vadd.f32 1.0, %v452_v6 }
  0x3a   : > { %453 = vrcp.f32 %v267_v7 }
  0x47   : > { %v454_v12 = vpop.eup %453 }
  0x48   : > { %v275_v13 = vrot.slane %v454_v12, %v274_v10  ;;  %v279_v14 = vrot.slane %v454_v12, %v278_v11 }
  0x4a   : > { %v280_v16 = vcombine.low %v275_v13, %v279_v14 }
  0x4c   : > { %v282_v17 = vmul.f32 %v280_v16, %v270_v15 }
  0x4e   : > { %283 = vst [vmem:[%s255_s9] sm:$0xff] %v282_v17 }
  0x4f PF: > { %s14_s14 = sadd.s32 1, %s496_s14   ;;  %s587_s12 = smov %s492_s13 }
  0x50   : > { %p11_p2 = scmp.ge.s32.totalorder %s14_s14, 4   ;;  %s588_s13 = smov %s590_s16 }
  0x52   :  { %13 = sbr.rel (!%p11_p2) target bundleno = 2 (0x2), region = 70 }
  0x57   :  { %314 = vsyncpa [#allocation3], 1 }
  0x58   :  { %316 = vsyncpa [#allocation3 + $0x1], 1 }

</bundles_post_ra>
